<compile_context>
chip_gen: v7x
topology: tpu7x:2x2x1
jax: 0.10.0
libtpu: 0.0.40
codegen_flags: <defaults>
</compile_context>

<pallas_src>
import functools
import math

import jax
import jax.numpy as jnp
from jax import lax
from jax.experimental import pallas as pl
from jax.experimental.pallas import tpu as pltpu


_INV_SQRT2 = 1.0 / math.sqrt(2.0)


def _gelu_exact(h):
    # torch nn.GELU() default: 0.5 * x * (1 + erf(x / sqrt(2)))
    return 0.5 * h * (1.0 + lax.erf(h * _INV_SQRT2))


def _excite(pooled_f32, w1t, w2t):
    # pooled: (NB, C) f32; w1t: (C, Cr) f32; w2t: (Cr, C) f32  -> (NB, C) f32
    h = jnp.dot(pooled_f32, w1t, preferred_element_type=jnp.float32)
    h = _gelu_exact(h)
    s = jnp.dot(h, w2t, preferred_element_type=jnp.float32)
    return jax.nn.sigmoid(s)


# ----------------------------- fused kernels ------------------------------- #

def _se_kernel_chw(x_ref, w1t_ref, w2t_ref, o_ref):
    # x_ref: (NB, C, HW) native dtype (HW on lanes).
    x = x_ref[...]
    hw = x_ref.shape[-1]
    # f32-accumulating reduce; avoids materializing a full-block f32 copy.
    pooled = jnp.sum(x, axis=-1, dtype=jnp.float32) * (1.0 / hw)        # (NB, C)
    scale = _excite(pooled, w1t_ref[...], w2t_ref[...]).astype(x.dtype)  # (NB, C)
    o_ref[...] = x * scale[:, :, None]


def _se_kernel_hwc(x_ref, w1t_ref, w2t_ref, o_ref):
    # x_ref: (NB, HW, C) native dtype (C on lanes, lane-dense when C % 128 == 0).
    x = x_ref[...]
    hw = x_ref.shape[1]
    pooled = jnp.sum(x, axis=1, dtype=jnp.float32) * (1.0 / hw)          # (NB, C)
    scale = _excite(pooled, w1t_ref[...], w2t_ref[...]).astype(x.dtype)  # (NB, C)
    o_ref[...] = x * scale[:, None, :]


# --------------------------- two-pass fallback ------------------------------ #

def _pool_excite_kernel(x_ref, w1t_ref, w2t_ref, scale_ref, acc_ref, *, inv_hw):
    # grid = (N, HW_tiles); acc_ref: (1, C) f32 scratch; scale_ref: (1, C) f32.
    t = pl.program_id(1)

    @pl.when(t == 0)
    def _():
        acc_ref[...] = jnp.zeros_like(acc_ref)

    acc_ref[...] += jnp.sum(x_ref[...], axis=-1, dtype=jnp.float32)

    @pl.when(t == pl.num_programs(1) - 1)
    def _():
        pooled = acc_ref[...] * inv_hw
        scale_ref[...] = _excite(pooled, w1t_ref[...], w2t_ref[...])


def _reweight_kernel(scale_ref, x_ref, o_ref):
    x = x_ref[...]
    o_ref[...] = x * scale_ref[...].astype(x.dtype)[:, :, None]


# ------------------------------- wrapper ----------------------------------- #

def _vmem_capacity_bytes():
    try:
        return int(pltpu.get_tpu_info().vmem_capacity_bytes)
    except Exception:
        return 64 * 1024 * 1024   # conservative (v7x per-TC VMEM)


def _vmem_limit_bytes(needed, cap):
    limit = min(cap - (8 << 20), max(32 << 20, int(needed)))
    return int(max(limit, int(needed)))


def _se_block_two_pass(x_flat, w1t, w2t, *, budget, vmem_cap):
    """Fallback when even a one-sample block does not fit VMEM: two streaming
    passes gridded over (N, HW tiles)."""
    N, C, HW = x_flat.shape
    Cr = w1t.shape[1]
    itemsize = jnp.dtype(x_flat.dtype).itemsize

    def fits(t):
        return 4 * C * t * itemsize <= budget

    # Pick an HW tile: a divisor of HW, preferring lane-dense multiples of 128.
    hw_tile = None
    for t in range(HW, 0, -1):
        if HW % t == 0 and t % 128 == 0 and fits(t):
            hw_tile = t
            break
    if hw_tile is None:
        for t in range(HW, 0, -1):
            if HW % t == 0 and fits(t):
                hw_tile = t
                break
    if hw_tile is None:
        hw_tile = 1
    n_t = HW // hw_tile
    # TODO(synk): this fallback keeps the (C, HW) in-kernel layout; it does not
    # apply the channels-last lane-density swap used by the fused path.

    weight_bytes = (w1t.size + w2t.size) * 4
    needed = 4 * C * hw_tile * itemsize + 2 * weight_bytes + 4 * C * 4 + (2 << 20)
    vmem_limit = _vmem_limit_bytes(needed, vmem_cap)

    scale = pl.pallas_call(
        functools.partial(_pool_excite_kernel, inv_hw=1.0 / HW),
        out_shape=jax.ShapeDtypeStruct((N, C), jnp.float32),
        grid=(N, n_t),
        in_specs=[
            pl.BlockSpec((1, C, hw_tile), lambda n, t: (n, 0, t)),
            pl.BlockSpec((C, Cr), lambda n, t: (0, 0)),     # resident weights
            pl.BlockSpec((Cr, C), lambda n, t: (0, 0)),
        ],
        out_specs=pl.BlockSpec((1, C), lambda n, t: (n, 0)),  # resident across t
        scratch_shapes=[pltpu.VMEM((1, C), jnp.float32)],
        compiler_params=pltpu.CompilerParams(
            dimension_semantics=("parallel", "arbitrary"),
            vmem_limit_bytes=vmem_limit),
    )(x_flat, w1t, w2t)

    out_flat = pl.pallas_call(
        _reweight_kernel,
        out_shape=jax.ShapeDtypeStruct((N, C, HW), x_flat.dtype),
        grid=(N, n_t),
        in_specs=[
            pl.BlockSpec((1, C), lambda n, t: (n, 0)),
            pl.BlockSpec((1, C, hw_tile), lambda n, t: (n, 0, t)),
        ],
        out_specs=pl.BlockSpec((1, C, hw_tile), lambda n, t: (n, 0, t)),
        compiler_params=pltpu.CompilerParams(
            dimension_semantics=("parallel", "arbitrary"),
            vmem_limit_bytes=vmem_limit),
    )(scale, x_flat)

    return out_flat


def se_block(x, w1, w2, *, vmem_block_budget_bytes=None, target_grid_steps=4):
    """SEBlock forward. x: (N, C, H, W); w1: (C//r, C); w2: (C, C//r)."""
    N, C, H, W = x.shape
    Cr = w1.shape[0]
    HW = H * W

    # Pre-transpose the 1x1-conv weights so both in-kernel matmuls are lane-dense:
    # (NB, C) @ (C, Cr) and (NB, Cr) @ (Cr, C).
    w1t = jnp.asarray(w1, jnp.float32).T   # (C, Cr)
    w2t = jnp.asarray(w2, jnp.float32).T   # (Cr, C)

    # ---- generation-aware VMEM budget ----
    vmem_cap = _vmem_capacity_bytes()
    if vmem_block_budget_bytes is None:
        # ~45 MiB on v7x (64 MiB VMEM), ~90 MiB on v5e/v6e (128 MiB VMEM);
        # leaves headroom for resident weights, semaphores, compiler scratch.
        vmem_block_budget_bytes = int(vmem_cap * 0.7)

    itemsize = jnp.dtype(x.dtype).itemsize
    block_elem_bytes = C * HW * itemsize
    weight_bytes = (w1t.size + w2t.size) * 4

    # ---- batch-block selection ----
    # Double-buffered in + out footprint ~= 4 * NB * block_bytes. Keep at least
    # min(N, target_grid_steps) grid steps (>= 2 per TC on v7x + pipelining).
    min_steps = min(N, max(1, target_grid_steps))
    nb = 0
    for cand in range(N, 0, -1):
        if N % cand != 0:
            continue
        if N // cand < min_steps:
            continue
        if 4 * cand * block_elem_bytes <= vmem_block_budget_bytes:
            nb = cand
            break

    x_flat = x.reshape(N, C, HW)

    if nb == 0:
        # Even a single-sample block exceeds the budget: two streaming passes.
        out_flat = _se_block_two_pass(x_flat, w1t, w2t,
                                      budget=vmem_block_budget_bytes,
                                      vmem_cap=vmem_cap)
        return out_flat.reshape(N, C, H, W)

    # ---- lane-density choice for the streaming axis ----
    use_hwc = (HW % 128 != 0) and (C % 128 == 0)
    if use_hwc:
        kernel = _se_kernel_hwc
        x_in = jnp.swapaxes(x_flat, 1, 2)          # (N, HW, C): lane-dense on C
        blk = (nb, HW, C)
    else:
        kernel = _se_kernel_chw
        x_in = x_flat                              # (N, C, HW)
        blk = (nb, C, HW)

    needed = 4 * nb * block_elem_bytes + 2 * weight_bytes + (2 << 20)
    vmem_limit = _vmem_limit_bytes(needed, vmem_cap)

    out = pl.pallas_call(
        kernel,
        out_shape=jax.ShapeDtypeStruct(x_in.shape, x.dtype),
        grid=(N // nb,),
        in_specs=[
            pl.BlockSpec(blk, lambda n: (n, 0, 0)),
            pl.BlockSpec((C, Cr), lambda n: (0, 0)),   # grid-invariant, resident
            pl.BlockSpec((Cr, C), lambda n: (0, 0)),   # grid-invariant, resident
        ],
        out_specs=pl.BlockSpec(blk, lambda n: (n, 0, 0)),
        compiler_params=pltpu.CompilerParams(
            dimension_semantics=("parallel",),
            vmem_limit_bytes=vmem_limit),
    )(x_in, w1t, w2t)

    if use_hwc:
        out = jnp.swapaxes(out, 1, 2)
    return out.reshape(N, C, H, W)


def se_block_ref(x, w1, w2):
    """Pure-JAX reference matching the PyTorch module."""
    pooled = jnp.mean(x, axis=(2, 3), keepdims=True)                 # (N,C,1,1)
    h = jnp.einsum('rc,nchw->nrhw', w1, pooled)                      # (N,Cr,1,1)
    h = 0.5 * h * (1.0 + lax.erf(h / math.sqrt(2.0)))
    s = jnp.einsum('cr,nrhw->nchw', w2, h)                           # (N,C,1,1)
    return x * jax.nn.sigmoid(s)


if __name__ == "__main__":
    key = jax.random.PRNGKey(0)
    k_x, k_w1, k_w2, k_x2, k_w3, k_w4 = jax.random.split(key, 6)

    # --- test 1: main fused path (HW multiple of 128, CHW layout) ---
    N, C, H, W = 2, 8, 16, 16
    reduction = 4
    Cr = C // reduction
    x = jax.random.normal(k_x, (N, C, H, W), dtype=jnp.float32)
    w1 = jax.random.normal(k_w1, (Cr, C), dtype=jnp.float32) * (1.0 / math.sqrt(C))
    w2 = jax.random.normal(k_w2, (C, Cr), dtype=jnp.float32) * (1.0 / math.sqrt(Cr))

    out = jax.block_until_ready(se_block(x, w1, w2))
    ref = se_block_ref(x, w1, w2)
    assert out.shape == (N, C, H, W)
    assert jnp.allclose(out, ref, atol=1e-5, rtol=1e-5), "mismatch (fused CHW path)"

    # --- test 2: lane-dense channels-last path (7x7 spatial, C % 128 == 0) ---
    N2, C2, H2, W2 = 2, 128, 7, 7
    Cr2 = C2 // reduction
    x2 = jax.random.normal(k_x2, (N2, C2, H2, W2), dtype=jnp.float32)
    w3 = jax.random.normal(k_w3, (Cr2, C2), dtype=jnp.float32) * (1.0 / math.sqrt(C2))
    w4 = jax.random.normal(k_w4, (C2, Cr2), dtype=jnp.float32) * (1.0 / math.sqrt(Cr2))

    out2 = jax.block_until_ready(se_block(x2, w3, w4))
    ref2 = se_block_ref(x2, w3, w4)
    assert jnp.allclose(out2, ref2, atol=1e-5, rtol=1e-5), "mismatch (HWC path)"

    # --- test 3: force the two-pass fallback with an artificially tiny budget ---
    out3 = jax.block_until_ready(
        se_block(x, w1, w2, vmem_block_budget_bytes=16 * 1024))
    assert jnp.allclose(out3, ref, atol=1e-5, rtol=1e-5), "mismatch (two-pass path)"

    print("KERNEL_OK")
</pallas_src>

<mosaic_0001>
module attributes {stable_mosaic.version = 11 : i64} {
  func.func @_se_kernel_chw(%arg0: i32, %arg1: memref<1x8x256xf32, #tpu.memory_space<vmem>>, %arg2: memref<8x2xf32, #tpu.memory_space<vmem>>, %arg3: memref<2x8xf32, #tpu.memory_space<vmem>>, %arg4: memref<1x8x256xf32, #tpu.memory_space<vmem>>) attributes {dimension_semantics = [#tpu.dimension_semantics<parallel>], iteration_bounds = array<i64: 2>, scalar_prefetch = 0 : i64, scratch_operands = 0 : i64, tpu.core_type = #tpu.core_type<tc>, window_params = [{transform_indices = @transform_0, window_bounds = array<i64: 1, 8, 256>}, {pipeline_mode = #tpu.pipeline_mode<synchronous>, transform_indices = @transform_1, window_bounds = array<i64: 8, 2>}, {pipeline_mode = #tpu.pipeline_mode<synchronous>, transform_indices = @transform_2, window_bounds = array<i64: 2, 8>}, {transform_indices = @transform_3, window_bounds = array<i64: 1, 8, 256>}]} {
    %c0 = arith.constant 0 : index
    %c0_0 = arith.constant 0 : index
    %c0_1 = arith.constant 0 : index
    %0 = vector.load %arg1[%c0, %c0_0, %c0_1] : memref<1x8x256xf32, #tpu.memory_space<vmem>>, vector<1x8x256xf32>
    %cst = arith.constant dense<0.000000e+00> : vector<1x8xf32>
    %1 = vector.multi_reduction <add>, %0, %cst [2] : vector<1x8x256xf32> to vector<1x8xf32>
    %cst_2 = arith.constant 3.906250e-03 : f32
    %2 = vector.broadcast %cst_2 : f32 to vector<1x8xf32>
    %3 = arith.mulf %1, %2 : vector<1x8xf32>
    %c0_3 = arith.constant 0 : index
    %c0_4 = arith.constant 0 : index
    %4 = vector.load %arg2[%c0_3, %c0_4] : memref<8x2xf32, #tpu.memory_space<vmem>>, vector<8x2xf32>
    %c0_5 = arith.constant 0 : index
    %c0_6 = arith.constant 0 : index
    %5 = vector.load %arg3[%c0_5, %c0_6] : memref<2x8xf32, #tpu.memory_space<vmem>>, vector<2x8xf32>
    %cst_7 = arith.constant dense<0.000000e+00> : vector<1x2xf32>
    %6 = tpu.matmul %3, %4, %cst_7 {dimension_numbers = #tpu.dot_dimension_numbers<[1], [0], [0], [1], [0, 0, 1, 1], [], []>} : vector<1x8xf32>, vector<8x2xf32>, vector<1x2xf32> -> vector<1x2xf32>
    %cst_8 = arith.constant 5.000000e-01 : f32
    %7 = vector.broadcast %cst_8 : f32 to vector<1x2xf32>
    %8 = arith.mulf %7, %6 : vector<1x2xf32>
    %cst_9 = arith.constant 0.707106769 : f32
    %9 = vector.broadcast %cst_9 : f32 to vector<1x2xf32>
    %10 = arith.mulf %6, %9 : vector<1x2xf32>
    %11 = math.erf %10 : vector<1x2xf32>
    %cst_10 = arith.constant 1.000000e+00 : f32
    %12 = vector.broadcast %cst_10 : f32 to vector<1x2xf32>
    %13 = arith.addf %12, %11 : vector<1x2xf32>
    %14 = arith.mulf %8, %13 : vector<1x2xf32>
    %cst_11 = arith.constant dense<0.000000e+00> : vector<1x8xf32>
    %15 = tpu.matmul %14, %5, %cst_11 {dimension_numbers = #tpu.dot_dimension_numbers<[1], [0], [0], [1], [0, 0, 1, 1], [], []>} : vector<1x2xf32>, vector<2x8xf32>, vector<1x8xf32> -> vector<1x8xf32>
    %16 = arith.negf %15 : vector<1x8xf32>
    %17 = math.exp %16 : vector<1x8xf32>
    %cst_12 = arith.constant 1.000000e+00 : f32
    %18 = vector.broadcast %cst_12 : f32 to vector<1x8xf32>
    %19 = arith.addf %18, %17 : vector<1x8xf32>
    %20 = arith.divf %18, %19 : vector<1x8xf32>
    %21 = vector.shape_cast %20 : vector<1x8xf32> to vector<1x8x1xf32>
    %22 = vector.broadcast %21 : vector<1x8x1xf32> to vector<1x8x256xf32>
    %23 = arith.mulf %0, %22 : vector<1x8x256xf32>
    %c0_13 = arith.constant 0 : index
    %c0_14 = arith.constant 0 : index
    %c0_15 = arith.constant 0 : index
    %24 = vector.load %arg4[%c0_13, %c0_14, %c0_15] : memref<1x8x256xf32, #tpu.memory_space<vmem>>, vector<1x8x256xf32>
    tpu.vector_store %arg4[%c0_13, %c0_14, %c0_15], %23 {strides = array<i32>} : memref<1x8x256xf32, #tpu.memory_space<vmem>>, vector<1x8x256xf32>,
    return
  }
  func.func @transform_0(%arg0: i32) -> (i32, i32, i32) {
    %c0_i32 = arith.constant 0 : i32
    %c0_i32_0 = arith.constant 0 : i32
    %c0_i32_1 = arith.constant 0 : i32
    return %arg0, %c0_i32, %c0_i32_0 : i32, i32, i32
  }
  func.func @transform_1(%arg0: i32) -> (i32, i32) {
    %c0_i32 = arith.constant 0 : i32
    %c0_i32_0 = arith.constant 0 : i32
    %c0_i32_1 = arith.constant 0 : i32
    return %c0_i32, %c0_i32_0 : i32, i32
  }
  func.func @transform_2(%arg0: i32) -> (i32, i32) {
    %c0_i32 = arith.constant 0 : i32
    %c0_i32_0 = arith.constant 0 : i32
    %c0_i32_1 = arith.constant 0 : i32
    return %c0_i32, %c0_i32_0 : i32, i32
  }
  func.func @transform_3(%arg0: i32) -> (i32, i32, i32) {
    %c0_i32 = arith.constant 0 : i32
    %c0_i32_0 = arith.constant 0 : i32
    %c0_i32_1 = arith.constant 0 : i32
    return %arg0, %c0_i32, %c0_i32_0 : i32, i32, i32
  }
}

</mosaic_0001>

<bundles_post_ra>
// kernel: tpu_custom_call.1
= control target key start
LH: loop header
LB: loop body
LE: loop exit
PB: predicated region body
PF: predicated region fallthrough
CT: control target
= control target key end

     0   :  { %8 = vsyncpa [#allocation3], 0  ;;  %s841_s0 = inlined_call_operand.hbm [shape: f32[2,8,256], index: 0, kind: input, shape index: {}]   ;;  %s842_s1 = inlined_call_operand.vmem [shape: f32[8,2], index: 1, kind: input, shape index: {}]   ;;  %s843_s2 = inlined_call_operand.vmem [shape: f32[2,8], index: 2, kind: input, shape index: {}]   ;;  %s844_s3 = inlined_call_operand.hbm [shape: f32[2,8,256], index: 3, kind: output, shape index: {}]  }
   0x1   :  { %10 = vsyncpa [#allocation3 + $0x1], 0 }
   0x2   :  { %11 = vsyncpa [#allocation4], 0 }
   0x3   :  { %13 = vsyncpa [#allocation4 + $0x1], 0  ;;  %s670_s12 = smov 0   ;;  %s672_s13 = smov 0  }
   0x4   :  { %s674_s14 = smov 0   ;;  %s676_s15 = smov 0  }
   0x5 LB: > { %s691_s16 = sadd.s32 4294967295, %s644_s15   ;;  %s460_s17 = sadd.s32 4294967294, %s644_s15   ;;  %s644_s15 = sphi %s676_s15, %s859_s15   ;;  %s640_s14 = sphi %s674_s14, %s858_s14   ;;  %s636_s13 = sphi %s672_s13, %s857_s13   ;;  %s632_s12 = sphi %s670_s12, %s856_s12  }
   0x6   : > { %s695_s18 = sadd.s32 1, %s644_s15   ;;  %s26_s19 = sadd.s32 1, %s640_s14 }
   0x7   : > { %s23_s20 = ssub.s32 %s644_s15, %s695_s18  ;;  %p33_p0 = scmp.ne.s32.totalorder %s640_s14, %s636_s13 }
   0x8   : > { %p24_p1 = scmp.eq.s32.totalorder %s23_s20, 0  ;;  %p34_p2 = scmp.eq.s32.totalorder %s644_s15, 0 }
   0x9   : > { %p39_p3 = scmp.ne.s32.totalorder %s636_s13, %s632_s12  ;;  %p40_p4 = scmp.eq.s32.totalorder %s691_s16, 0 }
   0xa   : > { %s707_s21 = scalar_select %p24_p1, %s640_s14, %s26_s19  }
   0xb   : > { %p709_p5 = por %p34_p2, %p33_p0  ;;  %p713_p6 = por %p40_p4, %p39_p3 }
   0xc   : > { %p105_p7 = scmp.eq.s32.totalorder %s691_s16, 1  ;;  %p111_p8 = scmp.eq.s32.totalorder %s460_s17, 1 }
   0xd   : > { %p506_p10 = scmp.lt.s32.totalorder %s644_s15, 2  ;;  %s137_s26 = sand.u32 1, %s640_s14  }
   0xe   : > { %p720_p11 = por %p105_p7, %p33_p0  ;;  %p724_p12 = por %p111_p8, %p39_p3 }
   0xf   : > { %s478_s27 = sshll.u32 %s644_s15, 8  ;;  %s463_s28 = sshll.u32 %s137_s26, 4 }
  0x10   : > { %s848_s24 = scalar_select %p720_p11, 1, 0 }
  0x11   : > { %s849_s25 = scalar_select %p724_p12, 1, 0 }
  0x12   : > { %s733_s4 = scalar_lea.hbm %s841_s0, %s478_s27  ;;  %s141_s5 = scalar_lea.vmem [#allocation2], %s463_s28 }
  0x13   : > { %s149_s6 = sshll.u32 %s141_s5, 4  ;;  %p737_p13 = pnand %p506_p10, %p709_p5  ;;  %s741_s6 = int_to_ptr.vmem [resolvable:$true] %s149_s6 }
  0x14   : > { %s138_s8 = scalar_lea.sflag [#allocation3], %s137_s26  ;;  %s548_s9 = scalar_lea.hbm %s733_s4, 256 }
  0x15   : > { %p549_p2 = scmp.ne.s32.totalorder %s733_s4, %s548_s9  ;;  %p550_p3 = pneg %p737_p13 }
  0x16   : > { %s553_s17 = scalar_lea.hbm %s841_s0, 512  ;;  %p554_p5 = scmp.lt.u32.totalorder %s733_s4, %s841_s0 }
  0x17   : > { %p551_p4 = pnand %p550_p3, %p549_p2  ;;  %p555_p8 = scmp.lt.u32.totalorder %s553_s17, %s548_s9 }
  0x18   : > { %p557_p9 = scmp.lt.u32.totalorder %s548_s9, %s733_s4 }
  0x19   : > { %p552_p7 = pneg %p551_p4  ;;  %p556_p10 = por %p555_p8, %p554_p5 }
  0x1b   : > { %p558_p0 = por %p557_p9, %p556_p10 }
  0x1d   : > { %p559_p1 = pnand %p558_p0, %p552_p7 }
  0x1f   : > { %562 = shalt.err (!%p559_p1)
}
  0x20   : > { %s563_s22 = scalar_lea.vmem %s741_s6, 256  ;;  %s646_s26 = smov [#allocation2]  }
  0x21   : > { %p564_p2 = scmp.ne.s32.totalorder %s741_s6, %s563_s22  ;;  %s568_s27 = sshll.u32 %s646_s26, 4  ;;  %s569_s27 = int_to_ptr.vmem [resolvable:$false] %s568_s27 }
  0x22   : > { %s570_s28 = scalar_lea.vmem %s569_s27, 512  ;;  %p571_p11 = scmp.lt.s32.totalorder %s741_s6, %s569_s27 }
  0x23   : > { %p566_p4 = pnand %p564_p2, %p550_p3  ;;  %p572_p5 = scmp.lt.s32.totalorder %s570_s28, %s563_s22 }
  0x25   : > { %p567_p12 = pneg %p566_p4  ;;  %p573_p8 = por %p572_p5, %p571_p11 }
  0x27   : > { %p574_p9 = pnand %p573_p8, %p567_p12 }
  0x29   : > { %577 = shalt.err (!%p574_p9)
}
  0x2a   : > { %501 = dma.hbm_to_vmem [thread:$0]  (!%p737_p13), %s733_s4, 256, %s741_s6, %s138_s8  }
  0x2b   : > { %p851_p0 = scmp.lt.s32.totalorder %s644_s15, 3  ;;  %p852_p1 = scmp.ge.s32.totalorder %s644_s15, 1 }
  0x2d   : > { %p155_p3 = pnand %p852_p1, %p851_p0 }
  0x2e   : > { %s775_s29 = sand.u32 (!%p155_p3), 1, %s636_s13  }
  0x2f   : > { %158 = sbr.rel (%p155_p3) target bundleno = 804 (0x324), region = 32  ;;  %s467_s30 = sshll.u32 (!%p155_p3), %s775_s29, 4 }
  0x30   : > { %s161_s5 = scalar_lea.sflag (!%p155_p3), [#allocation3], %s775_s29  ;;  %s164_s7 = scalar_lea.vmem (!%p155_p3), [#allocation2], %s467_s30 }
  0x36   : > { %623 = dma.done.wait (%p713_p6), %s161_s5, 256  }
  0x37   : > { %625 = vsyncadd (%p713_p6), %s161_s5, 4294967040  ;;  %v187_v0 = vld [vmem:[%s164_s7] sm:$0xff]  ;;  %v188_v1 = vld [vmem:[%s164_s7 + $0x8] sm:$0xff]  ;;  %v647_v3 = vmov 0.0   ;;  %vm648_vm0 = vmmov 0   ;;  %v196_v5 = vlaneseq  ;;  %vm202_vm1 = vcmask 64512  }
  0x38   : > { %v189_v2 = vadd.f32 %v188_v1, %v187_v0  ;;  %484 = vmatprep.subr.mxu0 %v647_v3  ;;  %v193_v4 = vld [vmem:[%s842_s1] sm:$0xff]  ;;  %489 = vmatprep.subr.mxu1 %v647_v3  ;;  %vm284_vm2 = vcmask 1041408   ;;  %vm280_vm3 = vcmask 15360   ;;  %s479_s9 = sshll.u32 %s691_s16, 8  ;;  %s186_s10 = scalar_lea.vmem [#allocation5], %s467_s30 }
  0x39   : > { %485 = vmatpush3.msra.mxu0 %v193_v4  ;;  %486 = vmatprep.mubr.msk.f32.mxu0 %vm648_vm0, %v647_v3  ;;  %v197_v6 = vand.u32 127, %v196_v5  ;;  %v199_v7 = vshrl.u32 %v196_v5, 7  ;;  %v194_v12 = vld [vmem:[%s843_s2] sm:$0x3]  ;;  %s390_s11 = sshll.u32 %s186_s10, 4  ;;  %s797_s20 = scalar_lea.hbm %s844_s3, %s479_s9  ;;  %s799_s11 = int_to_ptr.vmem [resolvable:$true] %s390_s11 }
  0x3a   : > { %190 = vadd.xlane.f32.xlu0 %v189_v2  ;;  %491 = vmatprep.mubr.msk.f32.mxu1 %vm648_vm0, %v647_v3  ;;  %s376_s22 = scalar_lea.sflag [#allocation4], %s775_s29  ;;  %s578_s16 = scalar_lea.vmem %s799_s11, 256 }
  0x3b   : > { %v200_v8 = vsub.s32 %v197_v6, %v199_v7  ;;  %490 = vmatpush3.msk.msra.mxu1 %vm284_vm2, %v194_v12  ;;  %v366_v25 = vsub.s32 0, %v199_v7  ;;  %p579_p6 = scmp.ne.s32.totalorder %s799_s11, %s578_s16  ;;  %p853_p11 = scmp.ne.s32.totalorder %s848_s24, 0 }
  0x3c   : > { %s649_s26 = smov [#allocation5]  }
  0x3d   : > { %p580_p12 = pnand %p579_p6, %p853_p11  ;;  %s582_s27 = sshll.u32 %s649_s26, 4  ;;  %s583_s27 = int_to_ptr.vmem [resolvable:$false] %s582_s27 }
  0x3e   : > { %s584_s28 = scalar_lea.vmem %s583_s27, 512  ;;  %p585_p7 = scmp.lt.s32.totalorder %s799_s11, %s583_s27 }
  0x3f   : > { %p581_p13 = pneg %p580_p12  ;;  %p586_p10 = scmp.lt.s32.totalorder %s584_s28, %s578_s16 }
  0x41   : > { %p587_p2 = por %p586_p10, %p585_p7 }
  0x43   : > { %p588_p4 = pnand %p587_p2, %p581_p13 }
  0xc7   : > { %v191_v9 = vpop.xlane.xlu0 %190 }
  0xc8   : > { %v192_v10 = vmul.f32 0.00390625, %v191_v9 }
  0xca   : > { %v201_v11 = vrot.slane %v192_v10, %v200_v8 }
  0xcc   : > { %487 = vmatmul.mubr.msk.f32.vlgmr.msra.gmra.mrb[0].mxu0 %vm202_vm1, %v201_v11 }
 0x19f   : > { %v271_v13 = vpop.f32.mrb[0].mxu0 }
 0x1a0   : > { %v276_v14 = vmul.f32 0.70710677, %v271_v13  ;;  %v488_v15 = vpop.f32.mrb[1].mxu0  ;;  %v275_v17 = vmul.f32 0.5, %v271_v13 }
 0x1a2   : > { %542 = verf.f32 %v276_v14 }
 0x1ac   : > { %v543_v16 = vpop.eup %542 }
 0x1ad   : > { %v278_v18 = vadd.f32 1.0, %v543_v16 }
 0x1af   : > { %v279_v19 = vmul.f32 %v278_v18, %v275_v17 }
 0x1b1   : > { %492 = vmatmul.mubr.msk.f32.vlgmr.msra.gmra.mrb[0].mxu1 %vm280_vm3, %v279_v19 }
 0x284   : > { %v354_v20 = vpop.f32.mrb[0].mxu1 }
 0x285   : > { %v472_v21 = vmul.f32 -1.442695, %v354_v20  ;;  %v493_v22 = vpop.f32.mrb[1].mxu1 }
 0x287   : > { %544 = vpow2.f32 %v472_v21 }
 0x291   : > { %v545_v23 = vpop.eup %544 }
 0x292   : > { %v361_v24 = vadd.f32 1.0, %v545_v23 }
 0x294   : > { %546 = vrcp.f32 %v361_v24 }
 0x29e   : > { %v547_v26 = vpop.eup %546 }
 0x29f   : > { %v367_v27 = vrot.slane %v547_v26, %v366_v25 }
 0x2a1   : > { %369 = vbcast.lane.b32.xlu0 %v367_v27, 256 }
 0x313   : > { %v370_v28 = vpop.permute.xlu0 %369 }
 0x314   : > { %v371_v29 = vmul.f32 %v370_v28, %v187_v0  ;;  %v372_v30 = vmul.f32 %v370_v28, %v188_v1 }
 0x316   : > { %373 = vst [vmem:[%s186_s10] sm:$0xff] %v371_v29  ;;  %374 = vst [vmem:[%s186_s10 + $0x8] sm:$0xff] %v372_v30 }
 0x317   : > { %591 = shalt.err (!%p588_p4)
}
 0x318   : > { %s592_s29 = scalar_lea.hbm %s797_s20, 256  ;;  %s596_s7 = scalar_lea.hbm %s844_s3, 512 }
 0x319   : > { %p593_p5 = scmp.ne.s32.totalorder %s797_s20, %s592_s29  ;;  %p597_p0 = scmp.lt.u32.totalorder %s797_s20, %s844_s3 }
 0x31a   : > { %p598_p1 = scmp.lt.u32.totalorder %s596_s7, %s592_s29  ;;  %p600_p6 = scmp.lt.u32.totalorder %s592_s29, %s797_s20 }
 0x31b   : > { %p594_p8 = pnand %p593_p5, %p853_p11 }
 0x31c   : > { %p599_p3 = por %p598_p1, %p597_p0 }
 0x31d   : > { %p595_p9 = pneg %p594_p8 }
 0x31e   : > { %p601_p12 = por %p600_p6, %p599_p3 }
 0x320   : > { %p602_p13 = pnand %p601_p12, %p595_p9 }
 0x322   : > { %605 = shalt.err (!%p602_p13)
}
 0x323   : > { %496 = dma.vmem_to_hbm [thread:$0]  (%p853_p11), %s799_s11, 256, %s797_s20, %s376_s22  }
 0x324 PF: > { %s402_s23 = sand.u32 1, %s632_s12   ;;  %p854_p7 = scmp.ne.s32.totalorder %s849_s25, 0 }
 0x325   : > { %p855_p10 = scmp.ge.s32.totalorder %s644_s15, 2  ;;  %s403_s8 = scalar_lea.sflag [#allocation4], %s402_s23 }
 0x327   : > { %p503_p2 = pnand %p855_p10, %p854_p7 }
 0x329   : > { %627 = dma.done.wait (!%p503_p2), %s403_s8, 256  }
 0x32a   : > { %629 = vsyncadd (!%p503_p2), %s403_s8, 4294967040  ;;  %p16_p4 = scmp.ge.s32.totalorder %s695_s18, 4   ;;  %s856_s12 = smov %s636_s13 }
 0x32b   : > { %s857_s13 = smov %s640_s14  ;;  %s858_s14 = smov %s707_s21 }
 0x32c   : > { %s859_s15 = smov %s695_s18  ;;  %18 = sbr.rel (!%p16_p4) target bundleno = 5 (0x5), region = 77 }
 0x333   :  { %408 = vsyncpa [#allocation3], 1 }
 0x334   :  { %410 = vsyncpa [#allocation3 + $0x1], 1 }
 0x335   :  { %411 = vsyncpa [#allocation4], 1 }
 0x336   :  { %413 = vsyncpa [#allocation4 + $0x1], 1 }

</bundles_post_ra>
